<compile_context>
chip_gen: v7x
topology: tpu7x:2x2x1
jax: 0.10.0
libtpu: 0.0.40
codegen_flags: <defaults>
</compile_context>

<pallas_src>
import functools

import jax
import jax.numpy as jnp
from jax import lax
from jax.experimental import pallas as pl
from jax.experimental.pallas import tpu as pltpu


def _round_up(x, m):
    return (x + m - 1) // m * m


def _cdiv(a, b):
    return -(-a // b)


def _pair(v):
    return (v, v) if isinstance(v, int) else tuple(v)


@functools.lru_cache(maxsize=None)
def _vmem_budget_and_limit():
    """Per-TPU-generation (block footprint budget, scoped vmem limit) in bytes."""
    cap = 64 * 1024 * 1024                      # assume the smallest gen (v7x)
    try:
        cap = int(pltpu.get_tpu_info().vmem_capacity_bytes)
    except Exception:
        pass
    limit = max(32 * 1024 * 1024, min(cap - 16 * 1024 * 1024, 100 * 1024 * 1024))
    return limit // 2, limit


# ---------------------------------------------------------------------------
# Fused kernels:  out = LeakyReLU( (A @ B) * scale + bias )
#   A, B blocks are bf16 (MXU-native); accumulation + epilogue in f32.
#   Block shapes: a (1,tm,K) b (1,K,tn) scale/bias (1,1,tn) o (1,tm,tn).
# ---------------------------------------------------------------------------
def _fused_kernel(a_ref, b_ref, scale_ref, bias_ref, o_ref, *, slope):
    acc = jnp.dot(a_ref[0], b_ref[0], preferred_element_type=jnp.float32)
    y = acc * scale_ref[0] + bias_ref[0]
    o_ref[0] = jnp.where(y > 0, y, slope * y).astype(o_ref.dtype)


def _fused_kernel_ktiled(a_ref, b_ref, scale_ref, bias_ref, o_ref, *, slope):
    # Output block index is constant along k, so o_ref stays resident in VMEM:
    # accumulate into it directly (no acc scratch), finalize in place.
    kk = pl.program_id(3)

    @pl.when(kk == 0)
    def _():
        o_ref[...] = jnp.zeros_like(o_ref)

    o_ref[0] = o_ref[0] + jnp.dot(a_ref[0], b_ref[0],
                                  preferred_element_type=jnp.float32)

    @pl.when(kk == pl.num_programs(3) - 1)
    def _():
        y = o_ref[0] * scale_ref[0] + bias_ref[0]
        o_ref[0] = jnp.where(y > 0, y, slope * y)


def _choose_tiles(m, k, n_pad, max_single_k):
    """Pick (tm, mp, tn, tk, kp, ksteps) from a per-generation VMEM budget."""
    budget, _ = _vmem_budget_and_limit()

    # Lane-dense N tile; prefer 256 (v6e/v7x MXU width) when it divides.
    tn = 256 if n_pad % 256 == 0 else 128

    if k <= max_single_k:
        tk, kp, ksteps = k, k, 1                 # single K tile: no reduction axis
    else:
        ksteps = _cdiv(k, max_single_k)
        tk = _round_up(_cdiv(k, ksteps), 128)
        kp = tk * ksteps

    # Double-buffered per-step footprint: 2*A(bf16) + 2*B(bf16) + 2*out(f32).
    fixed = 2 * tk * tn * 2 + 4 * tn * 4
    per_row = 2 * tk * 2 + 2 * tn * 4
    tm_max = max(16, (budget - fixed) // per_row)
    tm_max = max(16, min(4096, (tm_max // 16) * 16))

    mp16 = _round_up(max(m, 1), 16)              # 16: bf16 sublane packing
    min_steps = 2 if mp16 >= 32 else 1           # >=2 parallel M blocks (v7x 2 TCs)
    msteps = max(min_steps, _cdiv(mp16, tm_max))
    tm = _round_up(_cdiv(mp16, msteps), 16)
    mp = tm * msteps
    return tm, mp, tn, tk, kp, ksteps


def fused_conv_matmul(a, b, scale, bias, *, slope=0.1,
                      out_dtype=jnp.float32, max_single_k=2048):
    """out[g] = LeakyReLU((a[g] @ b[g]) * scale[g] + bias[g]).

    a: (G, M, K)   b: (G, K, N)   scale/bias: (G, 1, N)   ->  (G, M, N).
    """
    g, m, k = a.shape
    gb, kb, n = b.shape
    assert (g, k) == (gb, kb), (a.shape, b.shape)

    a = a.astype(jnp.bfloat16)                   # MXU-native operands
    b = b.astype(jnp.bfloat16)
    scale = scale.astype(jnp.float32)            # f32 epilogue
    bias = bias.astype(jnp.float32)

    n_pad = _round_up(n, 128)                    # lane-dense output stores
    tm, mp, tn, tk, kp, ksteps = _choose_tiles(m, k, n_pad, max_single_k)
    _, vmem_limit = _vmem_budget_and_limit()

    if n_pad != n:                               # pad with zeros (dead region)
        b = jnp.pad(b, ((0, 0), (0, 0), (0, n_pad - n)))
        scale = jnp.pad(scale, ((0, 0), (0, 0), (0, n_pad - n)))
        bias = jnp.pad(bias, ((0, 0), (0, 0), (0, n_pad - n)))
    if mp != m:
        a = jnp.pad(a, ((0, 0), (0, mp - m), (0, 0)))
    if kp != k:
        a = jnp.pad(a, ((0, 0), (0, 0), (0, kp - k)))
        b = jnp.pad(b, ((0, 0), (0, kp - k), (0, 0)))

    if ksteps == 1:
        grid = (g, mp // tm, n_pad // tn)
        out = pl.pallas_call(
            functools.partial(_fused_kernel, slope=slope),
            out_shape=jax.ShapeDtypeStruct((g, mp, n_pad), out_dtype),
            grid_spec=pltpu.PrefetchScalarGridSpec(
                num_scalar_prefetch=0,
                grid=grid,
                in_specs=[
                    pl.BlockSpec((1, tm, kp), lambda gi, i, j: (gi, i, 0)),
                    pl.BlockSpec((1, kp, tn), lambda gi, i, j: (gi, 0, j)),
                    pl.BlockSpec((1, 1, tn), lambda gi, i, j: (gi, 0, j)),
                    pl.BlockSpec((1, 1, tn), lambda gi, i, j: (gi, 0, j)),
                ],
                out_specs=pl.BlockSpec((1, tm, tn), lambda gi, i, j: (gi, i, j)),
            ),
            compiler_params=pltpu.CompilerParams(
                dimension_semantics=("parallel", "parallel", "parallel"),
                vmem_limit_bytes=vmem_limit),
        )(a, b, scale, bias)
    else:
        grid = (g, mp // tm, n_pad // tn, ksteps)
        out = pl.pallas_call(
            functools.partial(_fused_kernel_ktiled, slope=slope),
            out_shape=jax.ShapeDtypeStruct((g, mp, n_pad), jnp.float32),
            grid_spec=pltpu.PrefetchScalarGridSpec(
                num_scalar_prefetch=0,
                grid=grid,
                in_specs=[
                    pl.BlockSpec((1, tm, tk), lambda gi, i, j, kk: (gi, i, kk)),
                    pl.BlockSpec((1, tk, tn), lambda gi, i, j, kk: (gi, kk, j)),
                    pl.BlockSpec((1, 1, tn), lambda gi, i, j, kk: (gi, 0, j)),
                    pl.BlockSpec((1, 1, tn), lambda gi, i, j, kk: (gi, 0, j)),
                ],
                out_specs=pl.BlockSpec((1, tm, tn),
                                       lambda gi, i, j, kk: (gi, i, j)),
            ),
            compiler_params=pltpu.CompilerParams(
                dimension_semantics=("parallel", "parallel", "parallel",
                                     "arbitrary"),
                vmem_limit_bytes=vmem_limit),
        )(a, b, scale, bias)
        if out.dtype != out_dtype:
            out = out.astype(out_dtype)

    return out[:, :m, :n]


# ---------------------------------------------------------------------------
# im2col glue (bf16 patches) + CNNBlock forward
# ---------------------------------------------------------------------------
def _im2col_patches(x, kh, kw, stride, padding):
    """x: (N,H,W,C) -> (N*Ho*Wo, kh*kw, C) bf16 patch tensor, plus Ho, Wo."""
    sh, sw = stride
    ph, pw = padding
    n, h, w, c = x.shape
    if ph or pw:
        x = jnp.pad(x, ((0, 0), (ph, ph), (pw, pw), (0, 0)))
    ho = (h + 2 * ph - kh) // sh + 1
    wo = (w + 2 * pw - kw) // sw + 1
    if kh == 1 and kw == 1 and sh == 1 and sw == 1:
        return x.reshape(n * ho * wo, 1, c), ho, wo         # pure reshape
    cols = [x[:, i:i + (ho - 1) * sh + 1:sh, j:j + (wo - 1) * sw + 1:sw, :]
            for i in range(kh) for j in range(kw)]
    patches = jnp.stack(cols, axis=3)                       # (N,Ho,Wo,T,C)
    # TODO(synk): for very large 3x3 layers, move the tap extraction into the
    # kernel (shifted-window reduction over a single NHWC HBM tensor) to avoid
    # the kh*kw x HBM expansion of the activation.
    return patches.reshape(n * ho * wo, kh * kw, c), ho, wo


def cnn_block_forward(x_nchw, params, *, stride=1, padding=0, groups=1,
                      eps=1e-5, out_dtype=jnp.float32):
    """CNNBlock: Conv2d(bias=False) -> BatchNorm2d (inference) -> LeakyReLU(0.1).

    x_nchw: (N, Cin, H, W); params["w"]: HWIO (kh, kw, Cin//groups, Cout).
    Returns NCHW output (dtype out_dtype), matching the PyTorch module.
    """
    if isinstance(padding, str):
        raise NotImplementedError("TODO(synk): string padding modes")
    sh, sw = _pair(stride)
    ph, pw = _pair(padding)

    w = params["w"]
    kh, kw, cin_g, cout = w.shape
    assert cout % groups == 0
    cout_g = cout // groups
    t = kh * kw

    # BatchNorm running stats stay in the f32 epilogue (acc * scale + bias) so
    # a large gamma/sqrt(var) never amplifies bf16 weight quantization error.
    scale = (params["gamma"] / jnp.sqrt(params["var"] + eps)).astype(jnp.float32)
    bias = (params["beta"] - params["mean"] * scale).astype(jnp.float32)

    x = jnp.transpose(x_nchw, (0, 2, 3, 1)).astype(jnp.bfloat16)  # NCHW->NHWC
    nb = x.shape[0]
    assert x.shape[-1] == cin_g * groups

    patches, ho, wo = _im2col_patches(x, kh, kw, (sh, sw), (ph, pw))
    m = patches.shape[0]

    if groups == 1:
        a = patches.reshape(1, m, t * cin_g)
    else:
        a = patches.reshape(m, t, groups, cin_g)
        a = jnp.transpose(a, (2, 0, 1, 3)).reshape(groups, m, t * cin_g)

    b = w.astype(jnp.bfloat16).reshape(t * cin_g, groups, cout_g)
    b = jnp.transpose(b, (1, 0, 2))                        # (G, Kg, Cout_g)
    scale_g = scale.reshape(groups, 1, cout_g)
    bias_g = bias.reshape(groups, 1, cout_g)

    out = fused_conv_matmul(a, b, scale_g, bias_g, slope=0.1,
                            out_dtype=out_dtype)           # (G, M, Cout_g)

    if groups == 1:
        y = out[0]
    else:
        y = jnp.transpose(out, (1, 0, 2)).reshape(m, cout)
    y = y.reshape(nb, ho, wo, cout)
    # TODO(synk): when chaining CNNBlocks, stay NHWC + bf16 between blocks and
    # skip this transpose / f32 writeback (pass out_dtype=jnp.bfloat16).
    return jnp.transpose(y, (0, 3, 1, 2))                   # NHWC->NCHW


# ---------------------------------------------------------------------------
# Pure-JAX reference (f32) and deterministic parameter init
# ---------------------------------------------------------------------------
def cnn_block_reference(x_nchw, params, *, stride=1, padding=0, groups=1,
                        eps=1e-5):
    sh, sw = _pair(stride)
    ph, pw = _pair(padding)
    x = jnp.transpose(x_nchw, (0, 2, 3, 1)).astype(jnp.float32)
    y = lax.conv_general_dilated(
        x, params["w"].astype(jnp.float32),
        window_strides=(sh, sw),
        padding=[(ph, ph), (pw, pw)],
        dimension_numbers=("NHWC", "HWIO", "NHWC"),
        feature_group_count=groups)
    scale = params["gamma"] / jnp.sqrt(params["var"] + eps)
    y = (y - params["mean"]) * scale + params["beta"]
    y = jnp.where(y > 0, y, 0.1 * y)
    return jnp.transpose(y, (0, 3, 1, 2))


def init_cnn_block_params(key, in_channels, out_channels, kernel_size,
                          groups=1):
    kh, kw = _pair(kernel_size)
    k_w, k_g, k_b, k_m, k_v = jax.random.split(key, 5)
    fan_in = kh * kw * (in_channels // groups)
    w = jax.random.normal(
        k_w, (kh, kw, in_channels // groups, out_channels),
        jnp.float32) / jnp.sqrt(jnp.float32(fan_in))
    gamma = 1.0 + 0.1 * jax.random.normal(k_g, (out_channels,), jnp.float32)
    beta = 0.1 * jax.random.normal(k_b, (out_channels,), jnp.float32)
    mean = 0.1 * jax.random.normal(k_m, (out_channels,), jnp.float32)
    var = 0.9 + 0.2 * jax.random.uniform(k_v, (out_channels,), jnp.float32)
    return {"w": w, "gamma": gamma, "beta": beta, "mean": mean, "var": var}


if __name__ == "__main__":
    key = jax.random.PRNGKey(0)
    k_x, k_p, k_p2, k_a, k_b, k_s, k_c = jax.random.split(key, 7)

    # CNNBlock(in_channels=4, out_channels=32, kernel_size=3, stride=1, padding=1)
    N, Cin, H, W = 2, 4, 16, 16
    Cout = 32
    x = jax.random.normal(k_x, (N, Cin, H, W), jnp.float32)     # NCHW
    params = init_cnn_block_params(k_p, Cin, Cout, 3)

    fwd = jax.jit(functools.partial(cnn_block_forward, stride=1, padding=1))
    out = fwd(x, params)
    jax.block_until_ready(out)
    assert out.shape == (N, Cout, H, W), out.shape
    assert bool(jnp.all(jnp.isfinite(out)))
    ref = cnn_block_reference(x, params, stride=1, padding=1)
    err = float(jnp.max(jnp.abs(out - ref)))
    assert err < 0.15, f"max abs error vs reference too large: {err}"

    # Second config: strided, unpadded, grouped conv (single kernel, group axis).
    params2 = init_cnn_block_params(k_p2, Cin, 16, 3, groups=2)
    fwd2 = jax.jit(functools.partial(cnn_block_forward, stride=2, padding=0,
                                     groups=2))
    out2 = fwd2(x, params2)
    jax.block_until_ready(out2)
    ref2 = cnn_block_reference(x, params2, stride=2, padding=0, groups=2)
    assert out2.shape == ref2.shape == (N, 16, 7, 7), out2.shape
    err2 = float(jnp.max(jnp.abs(out2 - ref2)))
    assert err2 < 0.15, f"grouped/strided config error too large: {err2}"

    # Third check: exercise the K-tiled (accumulate-into-output) path directly.
    A = jax.random.normal(k_a, (1, 160, 512), jnp.float32)
    B = jax.random.normal(k_b, (1, 512, 96), jnp.float32)
    sc = jax.random.uniform(k_s, (1, 1, 96), jnp.float32, minval=0.5, maxval=1.5)
    bi = jax.random.normal(k_c, (1, 1, 96), jnp.float32)
    out3 = jax.jit(functools.partial(fused_conv_matmul, max_single_k=256))(
        A, B, sc, bi)
    jax.block_until_ready(out3)
    af = A.astype(jnp.bfloat16).astype(jnp.float32)
    bf = B.astype(jnp.bfloat16).astype(jnp.float32)
    y3 = jnp.einsum("gmk,gkn->gmn", af, bf) * sc + bi
    ref3 = jnp.where(y3 > 0, y3, 0.1 * y3)
    err3 = float(jnp.max(jnp.abs(out3 - ref3)))
    assert err3 < 2e-2, f"K-tiled path error too large: {err3}"

    print("KERNEL_OK")
</pallas_src>

<mosaic_0001>
module attributes {stable_mosaic.version = 11 : i64} {
  func.func @_fused_kernel(%arg0: i32, %arg1: i32, %arg2: i32, %arg3: memref<1x256x36xbf16, #tpu.memory_space<vmem>>, %arg4: memref<1x36x128xbf16, #tpu.memory_space<vmem>>, %arg5: memref<1x1x128xf32, #tpu.memory_space<vmem>>, %arg6: memref<1x1x128xf32, #tpu.memory_space<vmem>>, %arg7: memref<1x256x128xf32, #tpu.memory_space<vmem>>) attributes {dimension_semantics = [#tpu.dimension_semantics<parallel>, #tpu.dimension_semantics<parallel>, #tpu.dimension_semantics<parallel>], iteration_bounds = array<i64: 1, 2, 1>, scalar_prefetch = 0 : i64, scratch_operands = 0 : i64, tpu.core_type = #tpu.core_type<tc>, window_params = [{transform_indices = @transform_0, window_bounds = array<i64: 1, 256, 36>}, {transform_indices = @transform_1, window_bounds = array<i64: 1, 36, 128>}, {transform_indices = @transform_2, window_bounds = array<i64: 1, 1, 128>}, {transform_indices = @transform_3, window_bounds = array<i64: 1, 1, 128>}, {transform_indices = @transform_4, window_bounds = array<i64: 1, 256, 128>}]} {
    %c0 = arith.constant 0 : index
    %c0_0 = arith.constant 0 : index
    %c0_1 = arith.constant 0 : index
    %0 = vector.load %arg3[%c0, %c0_0, %c0_1] : memref<1x256x36xbf16, #tpu.memory_space<vmem>>, vector<1x256x36xbf16>
    %1 = vector.shape_cast %0 : vector<1x256x36xbf16> to vector<256x36xbf16>
    %c0_2 = arith.constant 0 : index
    %c0_3 = arith.constant 0 : index
    %c0_4 = arith.constant 0 : index
    %2 = vector.load %arg4[%c0_2, %c0_3, %c0_4] : memref<1x36x128xbf16, #tpu.memory_space<vmem>>, vector<1x36x128xbf16>
    %3 = vector.shape_cast %2 : vector<1x36x128xbf16> to vector<36x128xbf16>
    %cst = arith.constant dense<0.000000e+00> : vector<256x128xf32>
    %4 = tpu.matmul %1, %3, %cst {dimension_numbers = #tpu.dot_dimension_numbers<[1], [0], [0], [1], [0, 0, 1, 1], [], []>} : vector<256x36xbf16>, vector<36x128xbf16>, vector<256x128xf32> -> vector<256x128xf32>
    %c0_5 = arith.constant 0 : index
    %c0_6 = arith.constant 0 : index
    %c0_7 = arith.constant 0 : index
    %5 = vector.load %arg5[%c0_5, %c0_6, %c0_7] : memref<1x1x128xf32, #tpu.memory_space<vmem>>, vector<1x1x128xf32>
    %6 = vector.shape_cast %5 : vector<1x1x128xf32> to vector<1x128xf32>
    %7 = vector.broadcast %6 : vector<1x128xf32> to vector<256x128xf32>
    %8 = arith.mulf %4, %7 : vector<256x128xf32>
    %c0_8 = arith.constant 0 : index
    %c0_9 = arith.constant 0 : index
    %c0_10 = arith.constant 0 : index
    %9 = vector.load %arg6[%c0_8, %c0_9, %c0_10] : memref<1x1x128xf32, #tpu.memory_space<vmem>>, vector<1x1x128xf32>
    %10 = vector.shape_cast %9 : vector<1x1x128xf32> to vector<1x128xf32>
    %11 = vector.broadcast %10 : vector<1x128xf32> to vector<256x128xf32>
    %12 = arith.addf %8, %11 : vector<256x128xf32>
    %cst_11 = arith.constant 0.000000e+00 : f32
    %13 = vector.broadcast %cst_11 : f32 to vector<256x128xf32>
    %14 = arith.cmpf ogt, %12, %13 : vector<256x128xf32>
    %cst_12 = arith.constant 1.000000e-01 : f32
    %15 = vector.broadcast %cst_12 : f32 to vector<256x128xf32>
    %16 = arith.mulf %15, %12 : vector<256x128xf32>
    %17 = arith.select %14, %12, %16 : vector<256x128xi1>, vector<256x128xf32>
    %c0_13 = arith.constant 0 : index
    %c0_14 = arith.constant 0 : index
    %c0_15 = arith.constant 0 : index
    %18 = vector.load %arg7[%c0_13, %c0_14, %c0_15] : memref<1x256x128xf32, #tpu.memory_space<vmem>>, vector<1x256x128xf32>
    %19 = vector.shape_cast %18 : vector<1x256x128xf32> to vector<256x128xf32>
    %20 = vector.shape_cast %17 : vector<256x128xf32> to vector<1x256x128xf32>
    tpu.vector_store %arg7[%c0_13, %c0_14, %c0_15], %20 {strides = array<i32>} : memref<1x256x128xf32, #tpu.memory_space<vmem>>, vector<1x256x128xf32>,
    return
  }
  func.func @transform_0(%arg0: i32, %arg1: i32, %arg2: i32) -> (i32, i32, i32) {
    %c0_i32 = arith.constant 0 : i32
    %c0_i32_0 = arith.constant 0 : i32
    return %arg0, %arg1, %c0_i32 : i32, i32, i32
  }
  func.func @transform_1(%arg0: i32, %arg1: i32, %arg2: i32) -> (i32, i32, i32) {
    %c0_i32 = arith.constant 0 : i32
    %c0_i32_0 = arith.constant 0 : i32
    return %arg0, %c0_i32, %arg2 : i32, i32, i32
  }
  func.func @transform_2(%arg0: i32, %arg1: i32, %arg2: i32) -> (i32, i32, i32) {
    %c0_i32 = arith.constant 0 : i32
    %c0_i32_0 = arith.constant 0 : i32
    return %arg0, %c0_i32, %arg2 : i32, i32, i32
  }
  func.func @transform_3(%arg0: i32, %arg1: i32, %arg2: i32) -> (i32, i32, i32) {
    %c0_i32 = arith.constant 0 : i32
    %c0_i32_0 = arith.constant 0 : i32
    return %arg0, %c0_i32, %arg2 : i32, i32, i32
  }
  func.func @transform_4(%arg0: i32, %arg1: i32, %arg2: i32) -> (i32, i32, i32) {
    %c0_i32 = arith.constant 0 : i32
    return %arg0, %arg1, %arg2 : i32, i32, i32
  }
}

</mosaic_0001>

<bundles_post_ra>
// kernel: cnn_block_forward.1
= control target key start
LH: loop header
LB: loop body
LE: loop exit
PB: predicated region body
PF: predicated region fallthrough
CT: control target
= control target key end

     0   :  { %9 = vsyncpa [#allocation3], 0  ;;  %s1597_s0 = inlined_call_operand.vmem [shape: bf16[1,512,36], index: 0, kind: input, shape index: {}]   ;;  %s1598_s1 = inlined_call_operand.vmem [shape: bf16[1,36,128], index: 1, kind: input, shape index: {}]   ;;  %s1599_s2 = inlined_call_operand.vmem [shape: f32[1,1,128], index: 2, kind: input, shape index: {}]   ;;  %s1600_s3 = inlined_call_operand.vmem [shape: f32[1,1,128], index: 3, kind: input, shape index: {}]   ;;  %s1601_s4 = inlined_call_operand.hbm [shape: f32[1,512,128], index: 4, kind: output, shape index: {}]  }
   0x1   :  { %11 = vsyncpa [#allocation3 + $0x1], 0  ;;  %s1324_s15 = smov 0   ;;  %s1326_s16 = smov 0  }
   0x2   :  { %s1328_s17 = smov 0   ;;  %s1330_s18 = smov 0  }
   0x3   :  { %s1332_s19 = smov 0   ;;  %s1334_s20 = smov 0  }
   0x4 LB: > { %s1021_s21 = sadd.s32 4294967295, %s1294_s20   ;;  %s1022_s22 = sadd.s32 4294967294, %s1294_s20   ;;  %s1294_s20 = sphi %s1334_s20, %s17_s20   ;;  %s1290_s19 = sphi %s1332_s19, %s1608_s19   ;;  %s1286_s18 = sphi %s1330_s18, %s1607_s18   ;;  %s1282_s17 = sphi %s1328_s17, %s1606_s17   ;;  %s1278_s16 = sphi %s1326_s16, %s1605_s16   ;;  %s1274_s15 = sphi %s1324_s15, %s1604_s15  }
   0x5   : > { %s32_s23 = sadd.s32 1, %s1290_s19  ;;  %s159_s24 = sadd.s32 1, %s1282_s17 }
   0x6   : > { %p34_p0 = scmp.ge.s32.totalorder %s32_s23, 2  ;;  %p169_p1 = scmp.ne.s32.totalorder %s1282_s17, %s1278_s16 }
   0x7   : > { %p170_p2 = scmp.eq.s32.totalorder %s1021_s21, 1  ;;  %p175_p3 = scmp.ne.s32.totalorder %s1278_s16, %s1274_s15 }
   0x8   : > { %s1610_s23 = smov (%p34_p0, %s32_s23), 0  ;;  %p176_p5 = scmp.eq.s32.totalorder %s1022_s22, 1 }
   0x9   : > { %p1364_p4 = por %p170_p2, %p169_p1  ;;  %s153_s26 = ssub.s32 %s1290_s19, %s1610_s23 }
   0xa   : > { %p1028_p6 = scmp.ge.s32.totalorder %s1294_s20, 1  ;;  %p157_p7 = scmp.eq.s32.totalorder %s153_s26, 0 }
   0xb   : > { %p1371_p8 = por %p176_p5, %p175_p3  ;;  %p236_p9 = scmp.lt.s32.totalorder %s1294_s20, 3 }
   0xc   : > { %s1377_s28 = scalar_select %p157_p7, %s1282_s17, %s159_s24  }
   0xd   : > { %p237_p10 = pnand %p1028_p6, %p236_p9 }
   0xe   : > { %v1197_v0 = vld [vmem:[%s1598_s1] sm:$0xff] (!%p237_p10)   ;;  %v1198_v1 = vld [vmem:[%s1598_s1 + $0x8] sm:$0xff] (!%p237_p10)   ;;  %s1030_s7 = sshll.u32 (!%p237_p10), %s1286_s18, 5  ;;  %v1199_v2 = vld [vmem:[%s1598_s1 + $0x10] ss:$0 sps:$4 sm:$0x33] (!%p237_p10)  }
   0xf   : > { %240 = sbr.rel (%p237_p10) target bundleno = 298 (0x12a), region = 36  ;;  %1094 = vmatprep.subr.bf16.mxu0 (!%p237_p10), %v1197_v0  ;;  %1132 = vmatprep.subr.bf16.mxu1 (!%p237_p10), %v1197_v0  ;;  %p289_p11 = scmp.lt.s32.totalorder (!%p237_p10), %s1030_s7, 63  ;;  %vm499_vm0 = vcmask (!%p237_p10), 1041408   ;;  %vm450_vm1 = vcmask (!%p237_p10), 293888   ;;  %v1430_v20 = vld [vmem:[%s1599_s2] ss:$0 sm:$0xff] (!%p237_p10) }
  0x10   : > { %1095 = vmatpush3.bf16.msra.mxu0 (!%p237_p10), %v1197_v0  ;;  %1135 = vmatpush3.bf16.msra.mxu1 (!%p237_p10), %v1197_v0  ;;  %v501_v3 = vsel (!%p237_p10), %vm499_vm0, %v1199_v2, 0  ;;  %s283_s14 = sand.u32 (!%p237_p10), 1, %s1278_s16   ;;  %v1435_v22 = vld [vmem:[%s1600_s3] ss:$0 sm:$0xff] (!%p237_p10)  ;;  %s1074_s5 = sshll.u32 (!%p237_p10), %s1286_s18, 12 }
  0x11   : > { %1096 = vmatprep.subr.bf16.mxu0 (!%p237_p10), %v1198_v1  ;;  %1133 = vmatprep.subr.bf16.mxu1 (!%p237_p10), %v1198_v1  ;;  %s1439_s29 = sshll.u32 (!%p237_p10), %s283_s14, 8  ;;  %s1541_s8 = scalar_lea.hbm (!%p237_p10), %s1601_s4, %s1074_s5 }
  0x12   : > { %s1456_s30 = scalar_lea.vmem (!%p237_p10), [#allocation2], %s1439_s29  ;;  %s1551_s9 = scalar_lea.sflag (!%p237_p10), [#allocation3], %s283_s14 }
  0x13   : > { %s887_s6 = sshll.u32 (!%p237_p10), %s1456_s30, 4  ;;  %s1296_s11 = smov (!%p237_p10), [#allocation2]   ;;  %s1543_s6 = int_to_ptr.vmem [resolvable:$true] %s887_s6 }
  0x14   : > { %1097 = vmatpush3.bf16.msra.mxu0 (!%p237_p10), %v1198_v1  ;;  %1136 = vmatpush3.bf16.msra.mxu1 (!%p237_p10), %v1198_v1  ;;  %s1220_s12 = sshll.u32 (!%p237_p10), %s1296_s11, 4  ;;  %s1221_s12 = int_to_ptr.vmem [resolvable:$false] %s1220_s12 }
  0x15   : > { %1138 = vmatprep.subr.msk.bf16.mxu0 (!%p237_p10), %vm499_vm0, %v1199_v2  ;;  %1139 = vmatprep.subr.msk.bf16.mxu1 (!%p237_p10), %vm499_vm0, %v1199_v2  ;;  %p1223_p1 = scmp.lt.s32.totalorder (!%p237_p10), %s1543_s6, %s1221_s12 }
  0x16   : > { %s1612_s7 = smov (!%p289_p11, %s1030_s7), 63 }
  0x17   : > { %s1031_s10 = sshll.u32 %s1612_s7, 2 }
  0x18   : > { %s1392_s13 = scalar_lea.vmem %s1597_s0, %s1031_s10  ;;  %1099 = vmatpush3.bf16.msra.mxu0 %v501_v3  ;;  %1137 = vmatpush3.bf16.msra.mxu1 %v501_v3  ;;  %s1216_s10 = scalar_lea.vmem %s1543_s6, 4096 }
  0x19   : > { %v1200_v4 = vld [vmem:[%s1392_s13] sm:$0xff]   ;;  %v1202_v6 = vld [vmem:[%s1392_s13 + $0x8] sm:$0xff]   ;;  %v1204_v8 = vld [vmem:[%s1392_s13 + $0x10] sm:$0xff]   ;;  %p1217_p12 = scmp.ne.s32.totalorder %s1543_s6, %s1216_s10 }
  0x1a   : > { %v1201_v5 = vld [vmem:[%s1392_s13 + $0x40] sm:$0xff]   ;;  %1100 = vmatprep.mubr.msk.bf16.mxu0 %vm450_vm1, %v1200_v4  ;;  %v1203_v7 = vld [vmem:[%s1392_s13 + $0x48] sm:$0xff]   ;;  %v1205_v9 = vld [vmem:[%s1392_s13 + $0x50] sm:$0xff]  }
  0x1b   : > { %1116 = vmatprep.mubr.msk.bf16.mxu1 %vm450_vm1, %v1201_v5  ;;  %1101 = vmatmul.mubr.msk.bf16.vlgmr.msra.gmra.mrb[0].mxu0 %vm450_vm1, %v1202_v6  ;;  %v1206_v10 = vld [vmem:[%s1392_s13 + $0x18] sm:$0xff]   ;;  %v1208_v12 = vld [vmem:[%s1392_s13 + $0x20] sm:$0xff]   ;;  %v1210_v14 = vld [vmem:[%s1392_s13 + $0x28] sm:$0xff]   ;;  %p1218_p13 = pnand %p1217_p12, %p1364_p4 }
  0x1c   : > { %1117 = vmatmul.mubr.msk.bf16.vlgmr.msra.gmra.mrb[0].mxu1 %vm450_vm1, %v1203_v7  ;;  %1104 = vmatprep.mubr.msk.bf16.mxu0 %vm450_vm1, %v1204_v8  ;;  %v1207_v11 = vld [vmem:[%s1392_s13 + $0x58] sm:$0xff]   ;;  %v1209_v13 = vld [vmem:[%s1392_s13 + $0x60] sm:$0xff]   ;;  %v1211_v15 = vld [vmem:[%s1392_s13 + $0x68] sm:$0xff]  }
  0x1d   : > { %1120 = vmatprep.mubr.msk.bf16.mxu1 %vm450_vm1, %v1205_v9  ;;  %v1212_v16 = vld [vmem:[%s1392_s13 + $0x30] sm:$0xff]   ;;  %v1214_v18 = vld [vmem:[%s1392_s13 + $0x38] sm:$0xff]   ;;  %p1219_p0 = pneg %p1218_p13 }
  0x1e   : > { %v1213_v17 = vld [vmem:[%s1392_s13 + $0x70] sm:$0xff]   ;;  %v1215_v19 = vld [vmem:[%s1392_s13 + $0x78] sm:$0xff]   ;;  %s1222_s13 = scalar_lea.vmem %s1221_s12, 8192 }
  0x1f   : > { %p1224_p2 = scmp.lt.s32.totalorder %s1222_s13, %s1216_s10 }
  0x21   : > { %p1225_p3 = por %p1224_p2, %p1223_p1 }
  0x23   : > { %1105 = vmatmul.mubr.msk.bf16.gmra.mrb[4].mxu0 %vm450_vm1, %v1206_v10  ;;  %p1226_p5 = pnand %p1225_p3, %p1219_p0 }
  0x24   : > { %1121 = vmatmul.mubr.msk.bf16.gmra.mrb[4].mxu1 %vm450_vm1, %v1207_v11  ;;  %1108 = vmatprep.mubr.msk.bf16.mxu0 %vm450_vm1, %v1208_v12 }
  0x25   : > { %1124 = vmatprep.mubr.msk.bf16.mxu1 %vm450_vm1, %v1209_v13 }
  0x2b   : > { %1109 = vmatmul.mubr.msk.bf16.gmra.mrb[8].mxu0 %vm450_vm1, %v1210_v14 }
  0x2c   : > { %1125 = vmatmul.mubr.msk.bf16.gmra.mrb[8].mxu1 %vm450_vm1, %v1211_v15  ;;  %1112 = vmatprep.mubr.msk.bf16.mxu0 %vm450_vm1, %v1212_v16 }
  0x2d   : > { %1128 = vmatprep.mubr.msk.bf16.mxu1 %vm450_vm1, %v1213_v17 }
  0x33   : > { %1113 = vmatmul.mubr.msk.bf16.gmra.mrb[12].mxu0 %vm450_vm1, %v1214_v18 }
  0x34   : > { %1129 = vmatmul.mubr.msk.bf16.gmra.mrb[12].mxu1 %vm450_vm1, %v1215_v19 }
  0xee   : > { %v1102_v21 = vpop.f32.mrb[0].mxu0 }
  0xef   : > { %v1118_v23 = vpop.f32.mrb[0].mxu1  ;;  %v673_v24 = vmul.f32 %v1102_v21, %v1430_v20  ;;  %v537_v26 = vpop.f32.mrb[1].mxu0 }
  0xf0   : > { %v689_v25 = vmul.f32 %v1118_v23, %v1430_v20  ;;  %v601_v27 = vpop.f32.mrb[1].mxu1  ;;  %v671_v28 = vmul.f32 %v1430_v20, %v537_v26  ;;  %v1103_v30 = vpop.f32.mrb[2].mxu0 }
  0xf1   : > { %v687_v29 = vmul.f32 %v1430_v20, %v601_v27  ;;  %v1119_v31 = vpop.f32.mrb[2].mxu1  ;;  %v712_v32 = vadd.f32 %v1435_v22, %v673_v24  ;;  %v674_v34 = vmul.f32 %v1103_v30, %v1430_v20  ;;  %v540_v36 = vpop.f32.mrb[3].mxu0 }
  0xf2   : > { %v728_v33 = vadd.f32 %v1435_v22, %v689_v25  ;;  %v690_v35 = vmul.f32 %v1119_v31, %v1430_v20  ;;  %v604_v37 = vpop.f32.mrb[3].mxu1  ;;  %v710_v38 = vadd.f32 %v1435_v22, %v671_v28  ;;  %v672_v40 = vmul.f32 %v1430_v20, %v540_v36 }
  0xf3   : > { %v726_v39 = vadd.f32 %v1435_v22, %v687_v29  ;;  %v688_v41 = vmul.f32 %v1430_v20, %v604_v37  ;;  %vm744_vm2 = vcmp.gt.f32.partialorder %v712_v32, 0.0  ;;  %v776_v42 = vmul.f32 0.1, %v712_v32 }
  0xf4   : > { %vm760_vm3 = vcmp.gt.f32.partialorder %v728_v33, 0.0  ;;  %v792_v43 = vmul.f32 0.1, %v728_v33  ;;  %vm742_vm4 = vcmp.gt.f32.partialorder %v710_v38, 0.0  ;;  %v774_v44 = vmul.f32 0.1, %v710_v38 }
  0xf5   : > { %vm758_vm5 = vcmp.gt.f32.partialorder %v726_v39, 0.0  ;;  %v790_v45 = vmul.f32 0.1, %v726_v39  ;;  %v808_v46 = vsel %vm744_vm2, %v712_v32, %v776_v42  ;;  %v713_v48 = vadd.f32 %v1435_v22, %v674_v34 }
  0xf6   : > { %v824_v47 = vsel %vm760_vm3, %v728_v33, %v792_v43  ;;  %v729_v49 = vadd.f32 %v1435_v22, %v690_v35  ;;  %840 = vst [vmem:[%s1456_s30 + $0x10] sm:$0xff] %v808_v46  ;;  %v806_v50 = vsel %vm742_vm4, %v710_v38, %v774_v44  ;;  %v711_v52 = vadd.f32 %v1435_v22, %v672_v40  ;;  %v1106_v54 = vpop.f32.mrb[4].mxu0 }
  0xf7   : > { %856 = vst [vmem:[%s1456_s30 + $0x90] sm:$0xff] %v824_v47  ;;  %v822_v51 = vsel %vm758_vm5, %v726_v39, %v790_v45  ;;  %v727_v53 = vadd.f32 %v1435_v22, %v688_v41  ;;  %v1122_v55 = vpop.f32.mrb[4].mxu1  ;;  %838 = vst [vmem:[%s1456_s30] sm:$0xff] %v806_v50  ;;  %vm745_vm6 = vcmp.gt.f32.partialorder %v713_v48, 0.0  ;;  %v777_v56 = vmul.f32 0.1, %v713_v48  ;;  %v553_v0 = vpop.f32.mrb[5].mxu0 }
  0xf8   : > { %854 = vst [vmem:[%s1456_s30 + $0x80] sm:$0xff] %v822_v51  ;;  %vm761_vm7 = vcmp.gt.f32.partialorder %v729_v49, 0.0  ;;  %v793_v57 = vmul.f32 0.1, %v729_v49  ;;  %vm743_vm8 = vcmp.gt.f32.partialorder %v711_v52, 0.0  ;;  %v677_v62 = vmul.f32 %v1106_v54, %v1430_v20  ;;  %v617_v1 = vpop.f32.mrb[5].mxu1 }
  0xf9   : > { %v775_v58 = vmul.f32 0.1, %v711_v52  ;;  %vm759_vm9 = vcmp.gt.f32.partialorder %v727_v53, 0.0  ;;  %v791_v59 = vmul.f32 0.1, %v727_v53  ;;  %v809_v60 = vsel %vm745_vm6, %v713_v48, %v777_v56  ;;  %v1107_v6 = vpop.f32.mrb[6].mxu0 }
  0xfa   : > { %v825_v61 = vsel %vm761_vm7, %v729_v49, %v793_v57  ;;  %v693_v63 = vmul.f32 %v1122_v55, %v1430_v20  ;;  %841 = vst [vmem:[%s1456_s30 + $0x18] sm:$0xff] %v809_v60  ;;  %v675_v4 = vmul.f32 %v1430_v20, %v553_v0  ;;  %v691_v5 = vmul.f32 %v1430_v20, %v617_v1  ;;  %v1123_v7 = vpop.f32.mrb[6].mxu1  ;;  %v556_v12 = vpop.f32.mrb[7].mxu0 }
  0xfb   : > { %857 = vst [vmem:[%s1456_s30 + $0x98] sm:$0xff] %v825_v61  ;;  %v807_v2 = vsel %vm743_vm8, %v711_v52, %v775_v58  ;;  %v823_v3 = vsel %vm759_vm9, %v727_v53, %v791_v59  ;;  %v716_v8 = vadd.f32 %v1435_v22, %v677_v62  ;;  %v678_v10 = vmul.f32 %v1107_v6, %v1430_v20  ;;  %v620_v13 = vpop.f32.mrb[7].mxu1 }
  0xfc   : > { %839 = vst [vmem:[%s1456_s30 + $0x8] sm:$0xff] %v807_v2  ;;  %855 = vst [vmem:[%s1456_s30 + $0x88] sm:$0xff] %v823_v3  ;;  %v732_v9 = vadd.f32 %v1435_v22, %v693_v63  ;;  %v694_v11 = vmul.f32 %v1123_v7, %v1430_v20  ;;  %v714_v14 = vadd.f32 %v1435_v22, %v675_v4 }
  0xfd   : > { %v730_v15 = vadd.f32 %v1435_v22, %v691_v5  ;;  %v676_v16 = vmul.f32 %v1430_v20, %v556_v12  ;;  %v692_v17 = vmul.f32 %v1430_v20, %v620_v13  ;;  %vm748_vm10 = vcmp.gt.f32.partialorder %v716_v8, 0.0 }
  0xfe   : > { %v780_v18 = vmul.f32 0.1, %v716_v8  ;;  %vm764_vm11 = vcmp.gt.f32.partialorder %v732_v9, 0.0  ;;  %v796_v19 = vmul.f32 0.1, %v732_v9  ;;  %vm746_vm12 = vcmp.gt.f32.partialorder %v714_v14, 0.0 }
  0xff   : > { %v778_v21 = vmul.f32 0.1, %v714_v14  ;;  %vm762_vm13 = vcmp.gt.f32.partialorder %v730_v15, 0.0  ;;  %v794_v23 = vmul.f32 0.1, %v730_v15  ;;  %v717_v26 = vadd.f32 %v1435_v22, %v678_v10  ;;  %v1110_v28 = vpop.f32.mrb[8].mxu0 }
 0x100   : > { %v812_v24 = vsel %vm748_vm10, %v716_v8, %v780_v18  ;;  %v828_v25 = vsel %vm764_vm11, %v732_v9, %v796_v19  ;;  %v733_v27 = vadd.f32 %v1435_v22, %v694_v11  ;;  %v1126_v29 = vpop.f32.mrb[8].mxu1  ;;  %v715_v32 = vadd.f32 %v1435_v22, %v676_v16  ;;  %v569_v34 = vpop.f32.mrb[9].mxu0 }
 0x101   : > { %844 = vst [vmem:[%s1456_s30 + $0x30] sm:$0xff] %v812_v24  ;;  %860 = vst [vmem:[%s1456_s30 + $0xb0] sm:$0xff] %v828_v25  ;;  %v810_v30 = vsel %vm746_vm12, %v714_v14, %v778_v21  ;;  %v826_v31 = vsel %vm762_vm13, %v730_v15, %v794_v23  ;;  %v731_v33 = vadd.f32 %v1435_v22, %v692_v17  ;;  %v633_v35 = vpop.f32.mrb[9].mxu1  ;;  %vm749_vm14 = vcmp.gt.f32.partialorder %v717_v26, 0.0  ;;  %v1111_v44 = vpop.f32.mrb[10].mxu0 }
 0x102   : > { %842 = vst [vmem:[%s1456_s30 + $0x20] sm:$0xff] %v810_v30  ;;  %858 = vst [vmem:[%s1456_s30 + $0xa0] sm:$0xff] %v826_v31  ;;  %v781_v36 = vmul.f32 0.1, %v717_v26  ;;  %vm765_vm15 = vcmp.gt.f32.partialorder %v733_v27, 0.0  ;;  %vm747_vm0 = vcmp.gt.f32.partialorder %v715_v32, 0.0  ;;  %v681_v42 = vmul.f32 %v1110_v28, %v1430_v20 }
 0x103   : > { %v797_v37 = vmul.f32 0.1, %v733_v27  ;;  %v779_v38 = vmul.f32 0.1, %v715_v32  ;;  %vm763_vm1 = vcmp.gt.f32.partialorder %v731_v33, 0.0  ;;  %v697_v43 = vmul.f32 %v1126_v29, %v1430_v20  ;;  %v1127_v45 = vpop.f32.mrb[10].mxu1 }
 0x104   : > { %v795_v39 = vmul.f32 0.1, %v731_v33  ;;  %v813_v40 = vsel %vm749_vm14, %v717_v26, %v781_v36  ;;  %v679_v48 = vmul.f32 %v1430_v20, %v569_v34  ;;  %v695_v49 = vmul.f32 %v1430_v20, %v633_v35  ;;  %v572_v50 = vpop.f32.mrb[11].mxu0  ;;  %v636_v51 = vpop.f32.mrb[11].mxu1 }
 0x105   : > { %v829_v41 = vsel %vm765_vm15, %v733_v27, %v797_v37  ;;  %845 = vst [vmem:[%s1456_s30 + $0x38] sm:$0xff] %v813_v40  ;;  %v811_v46 = vsel %vm747_vm0, %v715_v32, %v779_v38  ;;  %v720_v52 = vadd.f32 %v1435_v22, %v681_v42  ;;  %v736_v53 = vadd.f32 %v1435_v22, %v697_v43 }
 0x106   : > { %861 = vst [vmem:[%s1456_s30 + $0xb8] sm:$0xff] %v829_v41  ;;  %v827_v47 = vsel %vm763_vm1, %v731_v33, %v795_v39  ;;  %843 = vst [vmem:[%s1456_s30 + $0x28] sm:$0xff] %v811_v46  ;;  %v682_v54 = vmul.f32 %v1111_v44, %v1430_v20  ;;  %v698_v55 = vmul.f32 %v1127_v45, %v1430_v20  ;;  %v1114_v60 = vpop.f32.mrb[12].mxu0 }
 0x107   : > { %859 = vst [vmem:[%s1456_s30 + $0xa8] sm:$0xff] %v827_v47  ;;  %v718_v56 = vadd.f32 %v1435_v22, %v679_v48  ;;  %v734_v57 = vadd.f32 %v1435_v22, %v695_v49  ;;  %v680_v58 = vmul.f32 %v1430_v20, %v572_v50  ;;  %v696_v59 = vmul.f32 %v1430_v20, %v636_v51  ;;  %v1130_v61 = vpop.f32.mrb[12].mxu1  ;;  %v585_v6 = vpop.f32.mrb[13].mxu0 }
 0x108   : > { %vm752_vm2 = vcmp.gt.f32.partialorder %v720_v52, 0.0  ;;  %v784_v62 = vmul.f32 0.1, %v720_v52  ;;  %vm768_vm3 = vcmp.gt.f32.partialorder %v736_v53, 0.0  ;;  %v800_v63 = vmul.f32 0.1, %v736_v53 }
 0x109   : > { %vm750_vm4 = vcmp.gt.f32.partialorder %v718_v56, 0.0  ;;  %v782_v0 = vmul.f32 0.1, %v718_v56  ;;  %vm766_vm5 = vcmp.gt.f32.partialorder %v734_v57, 0.0  ;;  %v798_v1 = vmul.f32 0.1, %v734_v57 }
 0x10a   : > { %v816_v2 = vsel %vm752_vm2, %v720_v52, %v784_v62  ;;  %v832_v3 = vsel %vm768_vm3, %v736_v53, %v800_v63  ;;  %v721_v4 = vadd.f32 %v1435_v22, %v682_v54  ;;  %v737_v5 = vadd.f32 %v1435_v22, %v698_v55  ;;  %v649_v7 = vpop.f32.mrb[13].mxu1  ;;  %v1115_v12 = vpop.f32.mrb[14].mxu0 }
 0x10b   : > { %848 = vst [vmem:[%s1456_s30 + $0x50] sm:$0xff] %v816_v2  ;;  %864 = vst [vmem:[%s1456_s30 + $0xd0] sm:$0xff] %v832_v3  ;;  %v814_v8 = vsel %vm750_vm4, %v718_v56, %v782_v0  ;;  %v830_v9 = vsel %vm766_vm5, %v734_v57, %v798_v1  ;;  %v719_v10 = vadd.f32 %v1435_v22, %v680_v58  ;;  %v1131_v13 = vpop.f32.mrb[14].mxu1  ;;  %v588_v24 = vpop.f32.mrb[15].mxu0 }
 0x10c   : > { %v735_v11 = vadd.f32 %v1435_v22, %v696_v59  ;;  %846 = vst [vmem:[%s1456_s30 + $0x40] sm:$0xff] %v814_v8  ;;  %862 = vst [vmem:[%s1456_s30 + $0xc0] sm:$0xff] %v830_v9  ;;  %vm753_vm6 = vcmp.gt.f32.partialorder %v721_v4, 0.0  ;;  %v785_v14 = vmul.f32 0.1, %v721_v4  ;;  %vm769_vm7 = vcmp.gt.f32.partialorder %v737_v5, 0.0 }
 0x10d   : > { %v801_v15 = vmul.f32 0.1, %v737_v5  ;;  %vm751_vm8 = vcmp.gt.f32.partialorder %v719_v10, 0.0  ;;  %v783_v16 = vmul.f32 0.1, %v719_v10  ;;  %v685_v21 = vmul.f32 %v1114_v60, %v1430_v20  ;;  %v652_v25 = vpop.f32.mrb[15].mxu1 }
 0x10e   : > { %vm767_vm9 = vcmp.gt.f32.partialorder %v735_v11, 0.0  ;;  %v799_v17 = vmul.f32 0.1, %v735_v11  ;;  %v817_v18 = vsel %vm753_vm6, %v721_v4, %v785_v14  ;;  %v701_v23 = vmul.f32 %v1130_v61, %v1430_v20 }
 0x10f   : > { %v833_v19 = vsel %vm769_vm7, %v737_v5, %v801_v15  ;;  %849 = vst [vmem:[%s1456_s30 + $0x58] sm:$0xff] %v817_v18  ;;  %v815_v26 = vsel %vm751_vm8, %v719_v10, %v783_v16  ;;  %v683_v28 = vmul.f32 %v1430_v20, %v585_v6  ;;  %v699_v29 = vmul.f32 %v1430_v20, %v649_v7 }
 0x110   : > { %865 = vst [vmem:[%s1456_s30 + $0xd8] sm:$0xff] %v833_v19  ;;  %v831_v27 = vsel %vm767_vm9, %v735_v11, %v799_v17  ;;  %847 = vst [vmem:[%s1456_s30 + $0x48] sm:$0xff] %v815_v26  ;;  %v724_v30 = vadd.f32 %v1435_v22, %v685_v21  ;;  %v740_v31 = vadd.f32 %v1435_v22, %v701_v23 }
 0x111   : > { %863 = vst [vmem:[%s1456_s30 + $0xc8] sm:$0xff] %v831_v27  ;;  %v686_v32 = vmul.f32 %v1115_v12, %v1430_v20  ;;  %v702_v33 = vmul.f32 %v1131_v13, %v1430_v20  ;;  %v722_v34 = vadd.f32 %v1435_v22, %v683_v28  ;;  %v738_v35 = vadd.f32 %v1435_v22, %v699_v29 }
 0x112   : > { %v684_v36 = vmul.f32 %v1430_v20, %v588_v24  ;;  %v700_v37 = vmul.f32 %v1430_v20, %v652_v25  ;;  %vm756_vm10 = vcmp.gt.f32.partialorder %v724_v30, 0.0  ;;  %v788_v38 = vmul.f32 0.1, %v724_v30 }
 0x113   : > { %vm772_vm11 = vcmp.gt.f32.partialorder %v740_v31, 0.0  ;;  %v804_v39 = vmul.f32 0.1, %v740_v31  ;;  %vm754_vm12 = vcmp.gt.f32.partialorder %v722_v34, 0.0  ;;  %v786_v40 = vmul.f32 0.1, %v722_v34 }
 0x114   : > { %vm770_vm13 = vcmp.gt.f32.partialorder %v738_v35, 0.0  ;;  %v802_v41 = vmul.f32 0.1, %v738_v35  ;;  %v820_v42 = vsel %vm756_vm10, %v724_v30, %v788_v38  ;;  %v725_v44 = vadd.f32 %v1435_v22, %v686_v32 }
 0x115   : > { %v836_v43 = vsel %vm772_vm11, %v740_v31, %v804_v39  ;;  %v741_v45 = vadd.f32 %v1435_v22, %v702_v33  ;;  %852 = vst [vmem:[%s1456_s30 + $0x70] sm:$0xff] %v820_v42  ;;  %v818_v20 = vsel %vm754_vm12, %v722_v34, %v786_v40  ;;  %v723_v47 = vadd.f32 %v1435_v22, %v684_v36 }
 0x116   : > { %868 = vst [vmem:[%s1456_s30 + $0xf0] sm:$0xff] %v836_v43  ;;  %v834_v46 = vsel %vm770_vm13, %v738_v35, %v802_v41  ;;  %v739_v48 = vadd.f32 %v1435_v22, %v700_v37  ;;  %850 = vst [vmem:[%s1456_s30 + $0x60] sm:$0xff] %v818_v20  ;;  %vm757_vm14 = vcmp.gt.f32.partialorder %v725_v44, 0.0  ;;  %v789_v49 = vmul.f32 0.1, %v725_v44 }
 0x117   : > { %866 = vst [vmem:[%s1456_s30 + $0xe0] sm:$0xff] %v834_v46  ;;  %vm773_vm15 = vcmp.gt.f32.partialorder %v741_v45, 0.0  ;;  %v805_v50 = vmul.f32 0.1, %v741_v45  ;;  %vm755_vm0 = vcmp.gt.f32.partialorder %v723_v47, 0.0 }
 0x118   : > { %v787_v51 = vmul.f32 0.1, %v723_v47  ;;  %vm771_vm1 = vcmp.gt.f32.partialorder %v739_v48, 0.0  ;;  %v803_v52 = vmul.f32 0.1, %v739_v48  ;;  %v821_v22 = vsel %vm757_vm14, %v725_v44, %v789_v49 }
 0x119   : > { %v837_v53 = vsel %vm773_vm15, %v741_v45, %v805_v50  ;;  %853 = vst [vmem:[%s1456_s30 + $0x78] sm:$0xff] %v821_v22 }
 0x11a   : > { %869 = vst [vmem:[%s1456_s30 + $0xf8] sm:$0xff] %v837_v53  ;;  %v819_v54 = vsel %vm755_vm0, %v723_v47, %v787_v51  ;;  %v835_v55 = vsel %vm771_vm1, %v739_v48, %v803_v52 }
 0x11b   : > { %851 = vst [vmem:[%s1456_s30 + $0x68] sm:$0xff] %v819_v54  ;;  %867 = vst [vmem:[%s1456_s30 + $0xe8] sm:$0xff] %v835_v55 }
 0x11c   : > { %1229 = shalt.err (!%p1226_p5)
}
 0x11d   : > { %s1230_s14 = scalar_lea.hbm %s1541_s8, 4096  ;;  %s1234_s24 = scalar_lea.hbm %s1601_s4, 8192 }
 0x11e   : > { %p1231_p6 = scmp.ne.s32.totalorder %s1541_s8, %s1230_s14  ;;  %p1235_p10 = scmp.lt.u32.totalorder %s1541_s8, %s1601_s4 }
 0x11f   : > { %p1236_p11 = scmp.lt.u32.totalorder %s1234_s24, %s1230_s14  ;;  %p1238_p13 = scmp.lt.u32.totalorder %s1230_s14, %s1541_s8 }
 0x120   : > { %p1232_p7 = pnand %p1231_p6, %p1364_p4 }
 0x121   : > { %p1237_p12 = por %p1236_p11, %p1235_p10 }
 0x122   : > { %p1233_p9 = pneg %p1232_p7 }
 0x123   : > { %p1239_p0 = por %p1238_p13, %p1237_p12 }
 0x125   : > { %p1240_p1 = pnand %p1239_p0, %p1233_p9 }
 0x127   : > { %1243 = shalt.err (!%p1240_p1)
}
 0x128   : > { %s1297_s30 = smov 128   ;;  %s1298_s5 = smov 8  }
 0x129   : > { %1140 = dma.vmem_to_hbm [thread:$0]  (%p1364_p4), %s1543_s6, 4096, %s1541_s8, %s1551_s9, %s1297_s30, %s1297_s30, %s1298_s5  }
 0x12a PF: > { %p1146_p2 = scmp.ge.s32.totalorder %s1294_s20, 2  ;;  %s902_s18 = sand.u32 1, %s1274_s15  }
 0x12b   : > { %s903_s7 = scalar_lea.sflag [#allocation3], %s902_s18 }
 0x12c   : > { %p1143_p3 = pnand %p1146_p2, %p1371_p8 }
 0x12e   : > { %1269 = dma.done.wait (!%p1143_p3), %s903_s7, 4096  }
 0x12f   : > { %1271 = vsyncadd (!%p1143_p3), %s903_s7, 4294963200  ;;  %s17_s20 = sadd.s32 1, %s1294_s20   ;;  %s1604_s15 = smov %s1278_s16 }
 0x130   : > { %p14_p5 = scmp.ge.s32.totalorder %s17_s20, 4   ;;  %s1605_s16 = smov %s1282_s17 }
 0x131   : > { %s1606_s17 = smov %s1377_s28  ;;  %s1607_s18 = smov %s1290_s19 }
 0x132   : > { %s1608_s19 = smov %s1610_s23  ;;  %16 = sbr.rel (!%p14_p5) target bundleno = 4 (0x4), region = 80 }
 0x139   :  { %908 = vsyncpa [#allocation3], 1 }
 0x13a   :  { %910 = vsyncpa [#allocation3 + $0x1], 1 }

</bundles_post_ra>
